<compile_context>
chip_gen: v7x
topology: tpu7x:2x2x1
jax: 0.10.0
libtpu: 0.0.40
codegen_flags: <defaults>
</compile_context>

<pallas_src>
import jax
import jax.numpy as jnp
from jax.experimental import pallas as pl
from jax.experimental.pallas import tpu as pltpu


def _round_up(n, m):
    return (n + m - 1) // m * m


def tower_kernel(x_ref, w1_ref, b1_ref, w2_ref, b2_ref, out_ref):
    # fc1: (tm, In) @ (In, H_p) on the MXU: bf16 operands, f32 accumulation.
    h = jnp.dot(x_ref[...], w1_ref[...], preferred_element_type=jnp.float32)
    # f32 epilogue on the VPU (required on v5e, free elsewhere): bias + ReLU.
    h = jnp.maximum(h + b1_ref[...], 0.0)
    # fc2: (tm, H_p) @ (H_p, Out_p): bf16 MXU, f32 accumulate, f32 bias.
    o = jnp.dot(h.astype(jnp.bfloat16), w2_ref[...],
                preferred_element_type=jnp.float32)
    out_ref[...] = (o + b2_ref[...]).astype(out_ref.dtype)  # lane-dense store


def preprocess_tower_params(w1, b1, w2, b2):
    """One-time weight prep (lane padding + bf16 cast), hoisted out of the
    per-call path.  w1: (In, H), b1: (H,), w2: (H, Out), b2: (Out,)."""
    In, H = w1.shape
    Out = w2.shape[1]
    H_p = _round_up(H, 128)        # lane-facing dims padded to 128
    Out_p = _round_up(Out, 128)
    # NOTE: the input-feature dim is intentionally NOT padded; zero padding of
    # H / Out is numerically exact through bias+ReLU+fc2 and sliced off later.
    w1_p = jnp.pad(w1, ((0, 0), (0, H_p - H))).astype(jnp.bfloat16)
    b1_p = jnp.pad(b1, (0, H_p - H)).reshape(1, H_p).astype(jnp.float32)
    w2_p = jnp.pad(w2, ((0, H_p - H), (0, Out_p - Out))).astype(jnp.bfloat16)
    b2_p = jnp.pad(b2, (0, Out_p - Out)).reshape(1, Out_p).astype(jnp.float32)
    return dict(w1=w1_p, b1=b1_p, w2=w2_p, b2=b2_p,
                in_features=In, hidden_p=H_p, out_features=Out, out_p=Out_p)


def _choose_batch_tiling(B, tm_max=256, tc_count=2):
    # Fewer / fuller tiles (per-step overhead ~0.35 us); when tiled, keep the
    # tile count a multiple of 2 so the parallel axis splits across v7x's TCs.
    n_tiles = max(1, -(-B // tm_max))
    if n_tiles > 1 and n_tiles % tc_count:
        n_tiles += tc_count - (n_tiles % tc_count)
    tm = _round_up(-(-B // n_tiles), 16)   # 16-row multiple: bf16 sublane pack
    return tm, n_tiles


def tower_forward(x, params, *, tm_max=256):
    """x: (B, in_features); params from preprocess_tower_params.
       Returns (B, out_features) in x.dtype."""
    B, In = x.shape
    assert In == params["in_features"]
    H_p, Out, Out_p = params["hidden_p"], params["out_features"], params["out_p"]

    tm, n_tiles = _choose_batch_tiling(B, tm_max=tm_max)
    Bp = tm * n_tiles

    # Stream activations as unpadded bf16; only the batch dim gains zero rows.
    x_p = jnp.pad(x.astype(jnp.bfloat16), ((0, Bp - B), (0, 0)))

    def build_in_specs(single_buffer_weights):
        kw = ({"pipeline_mode": pl.Buffered(1)}
              if single_buffer_weights else {})
        return [
            pl.BlockSpec((tm, In), lambda i: (i, 0)),              # x streamed
            pl.BlockSpec((In, H_p), lambda i: (0, 0), **kw),       # w1 resident
            pl.BlockSpec((1, H_p), lambda i: (0, 0), **kw),        # b1 resident
            pl.BlockSpec((H_p, Out_p), lambda i: (0, 0), **kw),    # w2 resident
            pl.BlockSpec((1, Out_p), lambda i: (0, 0), **kw),      # b2 resident
        ]

    def run(single_buffer_weights):
        return pl.pallas_call(
            tower_kernel,
            out_shape=jax.ShapeDtypeStruct((Bp, Out_p), x.dtype),
            grid=(n_tiles,),
            in_specs=build_in_specs(single_buffer_weights),
            out_specs=pl.BlockSpec((tm, Out_p), lambda i: (i, 0)),
            compiler_params=pltpu.CompilerParams(
                dimension_semantics=("parallel",),
                vmem_limit_bytes=32 * 1024 * 1024,
            ),
        )(x_p, params["w1"], params["b1"], params["w2"], params["b2"])

    try:
        out_p = run(single_buffer_weights=True)
    except Exception:
        # Fallback for JAX builds without pipeline_mode on top-level BlockSpecs.
        out_p = run(single_buffer_weights=False)

    return out_p[:B, :Out]


def init_tower_params(key, input_size, output_size, hidden_size):
    # Deterministic init mimicking nn.Linear default (uniform +-1/sqrt(fan_in)).
    k1, k2, k3, k4 = jax.random.split(key, 4)
    lim1 = 1.0 / jnp.sqrt(input_size)
    lim2 = 1.0 / jnp.sqrt(hidden_size)
    # Stored as (in, out) = transpose of PyTorch's (out, in) weight layout.
    w1 = jax.random.uniform(k1, (input_size, hidden_size), jnp.float32, -lim1, lim1)
    b1 = jax.random.uniform(k2, (hidden_size,), jnp.float32, -lim1, lim1)
    w2 = jax.random.uniform(k3, (hidden_size, output_size), jnp.float32, -lim2, lim2)
    b2 = jax.random.uniform(k4, (output_size,), jnp.float32, -lim2, lim2)
    return w1, b1, w2, b2


if __name__ == "__main__":
    key = jax.random.PRNGKey(0)
    # Small shapes consistent with Tower; batch exercises the 2-tile grid
    # (tm=160, Bp=320) plus batch/output slicing.
    batch, input_size, hidden_size, output_size = 300, 32, 64, 4

    kx, kp = jax.random.split(key)
    x = jax.random.normal(kx, (batch, input_size), jnp.float32)
    w1, b1, w2, b2 = init_tower_params(kp, input_size, output_size, hidden_size)

    params = preprocess_tower_params(w1, b1, w2, b2)   # one-time weight prep
    out = jax.block_until_ready(tower_forward(x, params))
    assert out.shape == (batch, output_size)

    # Reference 1: pure-f32 forward (loose tolerance — kernel matmuls are bf16).
    ref_f32 = jnp.maximum(x @ w1 + b1, 0.0) @ w2 + b2
    assert jnp.allclose(out, ref_f32, atol=5e-2, rtol=5e-2), "mismatch vs f32 reference"

    # Reference 2: mixed-precision forward matching the kernel's numerics.
    h_ref = jnp.maximum(
        jnp.dot(x.astype(jnp.bfloat16), w1.astype(jnp.bfloat16),
                preferred_element_type=jnp.float32) + b1, 0.0)
    ref_bf16 = jnp.dot(h_ref.astype(jnp.bfloat16), w2.astype(jnp.bfloat16),
                       preferred_element_type=jnp.float32) + b2
    assert jnp.allclose(out, ref_bf16, atol=1e-3, rtol=1e-3), "mismatch vs bf16 reference"

    print("KERNEL_OK")
</pallas_src>

<mosaic_0001>
module attributes {stable_mosaic.version = 11 : i64} {
  func.func @tower_kernel(%arg0: i32, %arg1: memref<160x32xbf16, #tpu.memory_space<vmem>>, %arg2: memref<32x128xbf16, #tpu.memory_space<vmem>>, %arg3: memref<1x128xf32, #tpu.memory_space<vmem>>, %arg4: memref<128x128xbf16, #tpu.memory_space<vmem>>, %arg5: memref<1x128xf32, #tpu.memory_space<vmem>>, %arg6: memref<160x128xf32, #tpu.memory_space<vmem>>) attributes {dimension_semantics = [#tpu.dimension_semantics<parallel>], iteration_bounds = array<i64: 2>, scalar_prefetch = 0 : i64, scratch_operands = 0 : i64, tpu.core_type = #tpu.core_type<tc>, window_params = [{transform_indices = @transform_0, window_bounds = array<i64: 160, 32>}, {pipeline_mode = #tpu.pipeline_mode<synchronous>, transform_indices = @transform_1, window_bounds = array<i64: 32, 128>}, {pipeline_mode = #tpu.pipeline_mode<synchronous>, transform_indices = @transform_2, window_bounds = array<i64: 1, 128>}, {pipeline_mode = #tpu.pipeline_mode<synchronous>, transform_indices = @transform_3, window_bounds = array<i64: 128, 128>}, {pipeline_mode = #tpu.pipeline_mode<synchronous>, transform_indices = @transform_4, window_bounds = array<i64: 1, 128>}, {transform_indices = @transform_5, window_bounds = array<i64: 160, 128>}]} {
    %c0 = arith.constant 0 : index
    %c0_0 = arith.constant 0 : index
    %0 = vector.load %arg1[%c0, %c0_0] : memref<160x32xbf16, #tpu.memory_space<vmem>>, vector<160x32xbf16>
    %c0_1 = arith.constant 0 : index
    %c0_2 = arith.constant 0 : index
    %1 = vector.load %arg2[%c0_1, %c0_2] : memref<32x128xbf16, #tpu.memory_space<vmem>>, vector<32x128xbf16>
    %cst = arith.constant dense<0.000000e+00> : vector<160x128xf32>
    %2 = tpu.matmul %0, %1, %cst {dimension_numbers = #tpu.dot_dimension_numbers<[1], [0], [0], [1], [0, 0, 1, 1], [], []>} : vector<160x32xbf16>, vector<32x128xbf16>, vector<160x128xf32> -> vector<160x128xf32>
    %c0_3 = arith.constant 0 : index
    %c0_4 = arith.constant 0 : index
    %3 = vector.load %arg3[%c0_3, %c0_4] : memref<1x128xf32, #tpu.memory_space<vmem>>, vector<1x128xf32>
    %4 = vector.broadcast %3 : vector<1x128xf32> to vector<160x128xf32>
    %5 = arith.addf %2, %4 : vector<160x128xf32>
    %cst_5 = arith.constant 0.000000e+00 : f32
    %6 = vector.broadcast %cst_5 : f32 to vector<160x128xf32>
    %7 = arith.maximumf %5, %6 : vector<160x128xf32>
    %8 = arith.truncf %7 : vector<160x128xf32> to vector<160x128xbf16>
    %c0_6 = arith.constant 0 : index
    %c0_7 = arith.constant 0 : index
    %9 = vector.load %arg4[%c0_6, %c0_7] : memref<128x128xbf16, #tpu.memory_space<vmem>>, vector<128x128xbf16>
    %cst_8 = arith.constant dense<0.000000e+00> : vector<160x128xf32>
    %10 = tpu.matmul %8, %9, %cst_8 {dimension_numbers = #tpu.dot_dimension_numbers<[1], [0], [0], [1], [0, 0, 1, 1], [], []>} : vector<160x128xbf16>, vector<128x128xbf16>, vector<160x128xf32> -> vector<160x128xf32>
    %c0_9 = arith.constant 0 : index
    %c0_10 = arith.constant 0 : index
    %11 = vector.load %arg5[%c0_9, %c0_10] : memref<1x128xf32, #tpu.memory_space<vmem>>, vector<1x128xf32>
    %12 = vector.broadcast %11 : vector<1x128xf32> to vector<160x128xf32>
    %13 = arith.addf %10, %12 : vector<160x128xf32>
    %c0_11 = arith.constant 0 : index
    %c0_12 = arith.constant 0 : index
    %14 = vector.load %arg6[%c0_11, %c0_12] : memref<160x128xf32, #tpu.memory_space<vmem>>, vector<160x128xf32>
    tpu.vector_store %arg6[%c0_11, %c0_12], %13 {strides = array<i32>} : memref<160x128xf32, #tpu.memory_space<vmem>>, vector<160x128xf32>,
    return
  }
  func.func @transform_0(%arg0: i32) -> (i32, i32) {
    %c0_i32 = arith.constant 0 : i32
    %c0_i32_0 = arith.constant 0 : i32
    return %arg0, %c0_i32 : i32, i32
  }
  func.func @transform_1(%arg0: i32) -> (i32, i32) {
    %c0_i32 = arith.constant 0 : i32
    %c0_i32_0 = arith.constant 0 : i32
    %c0_i32_1 = arith.constant 0 : i32
    return %c0_i32, %c0_i32_0 : i32, i32
  }
  func.func @transform_2(%arg0: i32) -> (i32, i32) {
    %c0_i32 = arith.constant 0 : i32
    %c0_i32_0 = arith.constant 0 : i32
    %c0_i32_1 = arith.constant 0 : i32
    return %c0_i32, %c0_i32_0 : i32, i32
  }
  func.func @transform_3(%arg0: i32) -> (i32, i32) {
    %c0_i32 = arith.constant 0 : i32
    %c0_i32_0 = arith.constant 0 : i32
    %c0_i32_1 = arith.constant 0 : i32
    return %c0_i32, %c0_i32_0 : i32, i32
  }
  func.func @transform_4(%arg0: i32) -> (i32, i32) {
    %c0_i32 = arith.constant 0 : i32
    %c0_i32_0 = arith.constant 0 : i32
    %c0_i32_1 = arith.constant 0 : i32
    return %c0_i32, %c0_i32_0 : i32, i32
  }
  func.func @transform_5(%arg0: i32) -> (i32, i32) {
    %c0_i32 = arith.constant 0 : i32
    %c0_i32_0 = arith.constant 0 : i32
    return %arg0, %c0_i32 : i32, i32
  }
}

module attributes {stable_mosaic.version = 11 : i64} {
  func.func @tower_kernel(%arg0: i32, %arg1: memref<160x32xbf16, #tpu.memory_space<vmem>>, %arg2: memref<32x128xbf16, #tpu.memory_space<vmem>>, %arg3: memref<1x128xf32, #tpu.memory_space<vmem>>, %arg4: memref<128x128xbf16, #tpu.memory_space<vmem>>, %arg5: memref<1x128xf32, #tpu.memory_space<vmem>>, %arg6: memref<160x128xf32, #tpu.memory_space<vmem>>) attributes {dimension_semantics = [#tpu.dimension_semantics<parallel>], iteration_bounds = array<i64: 2>, scalar_prefetch = 0 : i64, scratch_operands = 0 : i64, tpu.core_type = #tpu.core_type<tc>, window_params = [{transform_indices = @transform_0, window_bounds = array<i64: 160, 32>}, {pipeline_mode = #tpu.pipeline_mode<synchronous>, transform_indices = @transform_1, window_bounds = array<i64: 32, 128>}, {pipeline_mode = #tpu.pipeline_mode<synchronous>, transform_indices = @transform_2, window_bounds = array<i64: 1, 128>}, {pipeline_mode = #tpu.pipeline_mode<synchronous>, transform_indices = @transform_3, window_bounds = array<i64: 128, 128>}, {pipeline_mode = #tpu.pipeline_mode<synchronous>, transform_indices = @transform_4, window_bounds = array<i64: 1, 128>}, {transform_indices = @transform_5, window_bounds = array<i64: 160, 128>}]} {
    %c0 = arith.constant 0 : index
    %c0_0 = arith.constant 0 : index
    %0 = vector.load %arg1[%c0, %c0_0] : memref<160x32xbf16, #tpu.memory_space<vmem>>, vector<160x32xbf16>
    %c0_1 = arith.constant 0 : index
    %c0_2 = arith.constant 0 : index
    %1 = vector.load %arg2[%c0_1, %c0_2] : memref<32x128xbf16, #tpu.memory_space<vmem>>, vector<32x128xbf16>
    %cst = arith.constant dense<0.000000e+00> : vector<160x128xf32>
    %2 = tpu.matmul %0, %1, %cst {dimension_numbers = #tpu.dot_dimension_numbers<[1], [0], [0], [1], [0, 0, 1, 1], [], []>} : vector<160x32xbf16>, vector<32x128xbf16>, vector<160x128xf32> -> vector<160x128xf32>
    %c0_3 = arith.constant 0 : index
    %c0_4 = arith.constant 0 : index
    %3 = vector.load %arg3[%c0_3, %c0_4] : memref<1x128xf32, #tpu.memory_space<vmem>>, vector<1x128xf32>
    %4 = vector.broadcast %3 : vector<1x128xf32> to vector<160x128xf32>
    %5 = arith.addf %2, %4 : vector<160x128xf32>
    %cst_5 = arith.constant 0.000000e+00 : f32
    %6 = vector.broadcast %cst_5 : f32 to vector<160x128xf32>
    %7 = arith.maximumf %5, %6 : vector<160x128xf32>
    %8 = arith.truncf %7 : vector<160x128xf32> to vector<160x128xbf16>
    %c0_6 = arith.constant 0 : index
    %c0_7 = arith.constant 0 : index
    %9 = vector.load %arg4[%c0_6, %c0_7] : memref<128x128xbf16, #tpu.memory_space<vmem>>, vector<128x128xbf16>
    %cst_8 = arith.constant dense<0.000000e+00> : vector<160x128xf32>
    %10 = tpu.matmul %8, %9, %cst_8 {dimension_numbers = #tpu.dot_dimension_numbers<[1], [0], [0], [1], [0, 0, 1, 1], [], []>} : vector<160x128xbf16>, vector<128x128xbf16>, vector<160x128xf32> -> vector<160x128xf32>
    %c0_9 = arith.constant 0 : index
    %c0_10 = arith.constant 0 : index
    %11 = vector.load %arg5[%c0_9, %c0_10] : memref<1x128xf32, #tpu.memory_space<vmem>>, vector<1x128xf32>
    %12 = vector.broadcast %11 : vector<1x128xf32> to vector<160x128xf32>
    %13 = arith.addf %10, %12 : vector<160x128xf32>
    %c0_11 = arith.constant 0 : index
    %c0_12 = arith.constant 0 : index
    %14 = vector.load %arg6[%c0_11, %c0_12] : memref<160x128xf32, #tpu.memory_space<vmem>>, vector<160x128xf32>
    tpu.vector_store %arg6[%c0_11, %c0_12], %13 {strides = array<i32>} : memref<160x128xf32, #tpu.memory_space<vmem>>, vector<160x128xf32>,
    return
  }
  func.func @transform_0(%arg0: i32) -> (i32, i32) {
    %c0_i32 = arith.constant 0 : i32
    %c0_i32_0 = arith.constant 0 : i32
    return %arg0, %c0_i32 : i32, i32
  }
  func.func @transform_1(%arg0: i32) -> (i32, i32) {
    %c0_i32 = arith.constant 0 : i32
    %c0_i32_0 = arith.constant 0 : i32
    %c0_i32_1 = arith.constant 0 : i32
    return %c0_i32, %c0_i32_0 : i32, i32
  }
  func.func @transform_2(%arg0: i32) -> (i32, i32) {
    %c0_i32 = arith.constant 0 : i32
    %c0_i32_0 = arith.constant 0 : i32
    %c0_i32_1 = arith.constant 0 : i32
    return %c0_i32, %c0_i32_0 : i32, i32
  }
  func.func @transform_3(%arg0: i32) -> (i32, i32) {
    %c0_i32 = arith.constant 0 : i32
    %c0_i32_0 = arith.constant 0 : i32
    %c0_i32_1 = arith.constant 0 : i32
    return %c0_i32, %c0_i32_0 : i32, i32
  }
  func.func @transform_4(%arg0: i32) -> (i32, i32) {
    %c0_i32 = arith.constant 0 : i32
    %c0_i32_0 = arith.constant 0 : i32
    %c0_i32_1 = arith.constant 0 : i32
    return %c0_i32, %c0_i32_0 : i32, i32
  }
  func.func @transform_5(%arg0: i32) -> (i32, i32) {
    %c0_i32 = arith.constant 0 : i32
    %c0_i32_0 = arith.constant 0 : i32
    return %arg0, %c0_i32 : i32, i32
  }
}

</mosaic_0001>

<bundles_post_ra>
// kernel: tpu_custom_call.1
= control target key start
LH: loop header
LB: loop body
LE: loop exit
PB: predicated region body
PF: predicated region fallthrough
CT: control target
= control target key end

     0   :  { %10 = vsyncpa [#allocation3], 0  ;;  %s1311_s0 = inlined_call_operand.vmem [shape: bf16[320,32], index: 0, kind: input, shape index: {}]   ;;  %s1312_s1 = inlined_call_operand.vmem [shape: bf16[32,128], index: 1, kind: input, shape index: {}]   ;;  %s1313_s2 = inlined_call_operand.vmem [shape: f32[1,128], index: 2, kind: input, shape index: {}]   ;;  %s1314_s3 = inlined_call_operand.vmem [shape: bf16[128,128], index: 3, kind: input, shape index: {}]   ;;  %s1315_s4 = inlined_call_operand.vmem [shape: f32[1,128], index: 4, kind: input, shape index: {}]   ;;  %s1316_s5 = inlined_call_operand.hbm [shape: f32[320,128], index: 5, kind: output, shape index: {}]  }
   0x1   :  { %12 = vsyncpa [#allocation3 + $0x1], 0  ;;  %s1080_s18 = smov 0   ;;  %s1082_s19 = smov 0  }
   0x2   :  { %s1084_s20 = smov 0   ;;  %s1086_s21 = smov 0  }
   0x3 LB: > { %s1101_s22 = sadd.s32 4294967295, %s1045_s21   ;;  %s774_s23 = sadd.s32 4294967294, %s1045_s21   ;;  %s1045_s21 = sphi %s1086_s21, %s1322_s21   ;;  %s1041_s20 = sphi %s1084_s20, %s1321_s20   ;;  %s1037_s19 = sphi %s1082_s19, %s1320_s19   ;;  %s1033_s18 = sphi %s1080_s18, %s1319_s18  }
   0x4   : > { %s1105_s24 = sadd.s32 1, %s1045_s21   ;;  %s135_s25 = sadd.s32 1, %s1041_s20 }
   0x5   : > { %s132_s26 = ssub.s32 %s1045_s21, %s1105_s24  ;;  %p145_p0 = scmp.ne.s32.totalorder %s1041_s20, %s1037_s19 }
   0x6   : > { %p133_p1 = scmp.eq.s32.totalorder %s132_s26, 0  ;;  %p146_p2 = scmp.eq.s32.totalorder %s1101_s22, 1 }
   0x7   : > { %p151_p3 = scmp.ne.s32.totalorder %s1037_s19, %s1033_s18  ;;  %p152_p4 = scmp.eq.s32.totalorder %s774_s23, 1 }
   0x8   : > { %s1116_s27 = scalar_select %p133_p1, %s1041_s20, %s135_s25  }
   0x9   : > { %p1118_p5 = por %p146_p2, %p145_p0  ;;  %p1122_p6 = por %p152_p4, %p151_p3 }
   0xa   : > { %p777_p7 = scmp.ge.s32.totalorder %s1045_s21, 1  ;;  %p191_p8 = scmp.lt.s32.totalorder %s1045_s21, 3 }
   0xc   : > { %p192_p9 = pnand %p777_p7, %p191_p8 }
   0xd   : > { %v963_v0 = vld [vmem:[%s1312_s1] sm:$0xff] (!%p192_p9)   ;;  %s219_s7 = smul.u32 (!%p192_p9), 20, %s1101_s22  ;;  %v964_v1 = vld [vmem:[%s1312_s1 + $0x8] sm:$0xff] (!%p192_p9)   ;;  %vm320_vm0 = vcmask (!%p192_p9), 261120   ;;  %v977_v4 = vld [vmem:[%s1314_s3 + $0x10] sm:$0xff] (!%p192_p9)   ;;  %s216_s16 = sand.u32 (!%p192_p9), 1, %s1037_s19  }
   0xe   : > { %195 = sbr.rel (%p192_p9) target bundleno = 512 (0x200), region = 40  ;;  %845 = vmatprep.subr.bf16.mxu0 (!%p192_p9), %v963_v0  ;;  %v975_v2 = vld [vmem:[%s1314_s3] sm:$0xff] (!%p192_p9)   ;;  %v976_v3 = vld [vmem:[%s1314_s3 + $0x8] sm:$0xff] (!%p192_p9)   ;;  %v978_v8 = vld [vmem:[%s1314_s3 + $0x18] sm:$0xff] (!%p192_p9)   ;;  %s1047_s11 = smov (!%p192_p9), [#allocation2]  }
   0xf   : > { %p220_p10 = scmp.lt.s32.totalorder (!%p192_p9), %s219_s7, 39  ;;  %846 = vmatpush3.bf16.msra.mxu0 (!%p192_p9), %v963_v0  ;;  %905 = vmatprep.subr.bf16.mxu1 (!%p192_p9), %v975_v2  ;;  %v979_v9 = vld [vmem:[%s1314_s3 + $0x20] sm:$0xff] (!%p192_p9)   ;;  %v980_v12 = vld [vmem:[%s1314_s3 + $0x28] sm:$0xff] (!%p192_p9)   ;;  %v981_v18 = vld [vmem:[%s1314_s3 + $0x30] sm:$0xff] (!%p192_p9)   ;;  %s814_s30 = smul.u32 (!%p192_p9), 2560, %s1101_s22 }
  0x10   : > { %847 = vmatprep.subr.bf16.mxu0 (!%p192_p9), %v964_v1  ;;  %913 = vmatpush3.bf16.msra.mxu1 (!%p192_p9), %v975_v2  ;;  %v982_v19 = vld [vmem:[%s1314_s3 + $0x38] sm:$0xff] (!%p192_p9)   ;;  %v1187_v20 = vld [vmem:[%s1313_s2] ss:$0 sm:$0xff] (!%p192_p9)  ;;  %s1270_s22 = scalar_lea.sflag (!%p192_p9), [#allocation3], %s216_s16  ;;  %s987_s12 = sshll.u32 (!%p192_p9), %s1047_s11, 4  ;;  %s988_s12 = int_to_ptr.vmem [resolvable:$false] %s987_s12 }
  0x11   : > { %906 = vmatprep.subr.bf16.mxu1 (!%p192_p9), %v976_v3  ;;  %s1260_s9 = scalar_lea.hbm (!%p192_p9), %s1316_s5, %s814_s30  ;;  %s989_s13 = scalar_lea.vmem (!%p192_p9), %s988_s12, 5120 }
  0x13   : > { %848 = vmatpush3.bf16.msra.mxu0 (!%p192_p9), %v964_v1 }
  0x14   : > { %869 = vmatprep.subr.bf16.mxu0 (!%p192_p9), %v975_v2  ;;  %914 = vmatpush3.bf16.msra.mxu1 (!%p192_p9), %v976_v3 }
  0x15   : > { %s1324_s7 = smov (!%p220_p10, %s219_s7), 39  ;;  %907 = vmatprep.subr.bf16.mxu1 %v977_v4 }
  0x16   : > { %s778_s14 = sshll.u32 %s1324_s7, 2 }
  0x17   : > { %s1144_s17 = scalar_lea.vmem %s1311_s0, %s778_s14 }
  0x18   : > { %v965_v5 = vld [vmem:[%s1144_s17] sm:$0xff]   ;;  %v966_v6 = vld [vmem:[%s1144_s17 + $0x8] sm:$0xff]   ;;  %v967_v7 = vld [vmem:[%s1144_s17 + $0x10] sm:$0xff]   ;;  %915 = vmatpush3.bf16.msra.mxu1 %v977_v4 }
  0x19   : > { %849 = vmatprep.mubr.msk.bf16.mxu0 %vm320_vm0, %v965_v5  ;;  %908 = vmatprep.subr.bf16.mxu1 %v978_v8  ;;  %v968_v10 = vld [vmem:[%s1144_s17 + $0x18] sm:$0xff]   ;;  %v969_v11 = vld [vmem:[%s1144_s17 + $0x20] sm:$0xff]   ;;  %v970_v13 = vld [vmem:[%s1144_s17 + $0x28] sm:$0xff]  }
  0x1a   : > { %850 = vmatmul.mubr.msk.bf16.vlgmr.msra.gmra.mrb[0].mxu0 %vm320_vm0, %v966_v6  ;;  %v971_v14 = vld [vmem:[%s1144_s17 + $0x30] sm:$0xff]   ;;  %v972_v15 = vld [vmem:[%s1144_s17 + $0x38] sm:$0xff]   ;;  %v973_v16 = vld [vmem:[%s1144_s17 + $0x40] sm:$0xff]  }
  0x1b   : > { %853 = vmatprep.mubr.msk.bf16.mxu0 %vm320_vm0, %v967_v7  ;;  %870 = vmatpush3.bf16.msra.mxu0 %v975_v2  ;;  %v974_v17 = vld [vmem:[%s1144_s17 + $0x48] sm:$0xff]   ;;  %s921_s17 = smul.u32 160, %s216_s16 }
  0x1c   : > { %871 = vmatprep.subr.bf16.mxu0 %v976_v3  ;;  %916 = vmatpush3.bf16.msra.mxu1 %v978_v8 }
  0x1d   : > { %909 = vmatprep.subr.bf16.mxu1 %v979_v9  ;;  %s1219_s26 = scalar_lea.vmem [#allocation2], %s921_s17 }
  0x1e   : > { %s712_s6 = sshll.u32 %s1219_s26, 4  ;;  %s1262_s6 = int_to_ptr.vmem [resolvable:$true] %s712_s6 }
  0x1f   : > { %872 = vmatpush3.bf16.msra.mxu0 %v976_v3  ;;  %s983_s10 = scalar_lea.vmem %s1262_s6, 2560  ;;  %p990_p0 = scmp.lt.s32.totalorder %s1262_s6, %s988_s12 }
  0x20   : > { %873 = vmatprep.subr.bf16.mxu0 %v977_v4  ;;  %917 = vmatpush3.bf16.msra.mxu1 %v979_v9  ;;  %p984_p11 = scmp.ne.s32.totalorder %s1262_s6, %s983_s10  ;;  %p991_p1 = scmp.lt.s32.totalorder %s989_s13, %s983_s10 }
  0x21   : > { %910 = vmatprep.subr.bf16.mxu1 %v980_v12 }
  0x22   : > { %854 = vmatmul.mubr.msk.bf16.gmra.mrb[4].mxu0 %vm320_vm0, %v968_v10  ;;  %p985_p12 = pnand %p984_p11, %p1118_p5  ;;  %p992_p2 = por %p991_p1, %p990_p0 }
  0x23   : > { %857 = vmatprep.mubr.msk.bf16.mxu0 %vm320_vm0, %v969_v11  ;;  %874 = vmatpush3.bf16.msra.mxu0 %v977_v4 }
  0x24   : > { %875 = vmatprep.subr.bf16.mxu0 %v978_v8  ;;  %918 = vmatpush3.bf16.msra.mxu1 %v980_v12  ;;  %p986_p13 = pneg %p985_p12 }
  0x25   : > { %911 = vmatprep.subr.bf16.mxu1 %v981_v18 }
  0x26   : > { %p993_p3 = pnand %p992_p2, %p986_p13 }
  0x27   : > { %876 = vmatpush3.bf16.msra.mxu0 %v978_v8 }
  0x28   : > { %877 = vmatprep.subr.bf16.mxu0 %v979_v9  ;;  %919 = vmatpush3.bf16.msra.mxu1 %v981_v18 }
  0x29   : > { %912 = vmatprep.subr.bf16.mxu1 %v982_v19 }
  0x2a   : > { %858 = vmatmul.mubr.msk.bf16.gmra.mrb[8].mxu0 %vm320_vm0, %v970_v13 }
  0x2b   : > { %861 = vmatprep.mubr.msk.bf16.mxu0 %vm320_vm0, %v971_v14  ;;  %878 = vmatpush3.bf16.msra.mxu0 %v979_v9 }
  0x2c   : > { %879 = vmatprep.subr.bf16.mxu0 %v980_v12  ;;  %920 = vmatpush3.bf16.msra.mxu1 %v982_v19 }
  0x2f   : > { %880 = vmatpush3.bf16.msra.mxu0 %v980_v12 }
  0x30   : > { %881 = vmatprep.subr.bf16.mxu0 %v981_v18 }
  0x32   : > { %862 = vmatmul.mubr.msk.bf16.gmra.mrb[12].mxu0 %vm320_vm0, %v972_v15 }
  0x33   : > { %865 = vmatprep.mubr.msk.bf16.mxu0 %vm320_vm0, %v973_v16  ;;  %882 = vmatpush3.bf16.msra.mxu0 %v981_v18 }
  0x34   : > { %883 = vmatprep.subr.bf16.mxu0 %v982_v19 }
  0x37   : > { %884 = vmatpush3.bf16.msra.mxu0 %v982_v19 }
  0x3a   : > { %866 = vmatmul.mubr.msk.bf16.gmra.mrb[16].mxu0 %vm320_vm0, %v974_v17 }
  0xed   : > { %v851_v21 = vpop.f32.mrb[0].mxu0 }
  0xee   : > { %v394_v22 = vadd.f32 %v851_v21, %v1187_v20  ;;  %v385_v23 = vpop.f32.mrb[1].mxu0 }
  0xef   : > { %v386_v24 = vadd.f32 %v1187_v20, %v385_v23  ;;  %v852_v25 = vpop.f32.mrb[2].mxu0 }
  0xf0   : > { %v397_v26 = vadd.f32 %v852_v25, %v1187_v20  ;;  %v388_v27 = vpop.f32.mrb[3].mxu0  ;;  %v466_v29 = vmax.f32 %v394_v22, 0.0 }
  0xf1   : > { %v389_v28 = vadd.f32 %v1187_v20, %v388_v27  ;;  %v464_v31 = vmax.f32 %v386_v24, 0.0 }
  0xf2   : > { %v467_v30 = vmax.f32 %v397_v26, 0.0 }
  0xf3   : > { %v465_v32 = vmax.f32 %v389_v28, 0.0  ;;  %v1215_v28 = vld [vmem:[%s1315_s4] ss:$0 sm:$0xff] }
  0xf4   : > { %v485_v33 = vpack.c.bf16 %v467_v30, %v466_v29 }
  0xf5   : > { %v484_v34 = vpack.c.bf16 %v465_v32, %v464_v31  ;;  %v855_v35 = vpop.f32.mrb[4].mxu0 }
  0xf6   : > { %v410_v36 = vadd.f32 %v855_v35, %v1187_v20  ;;  %v401_v37 = vpop.f32.mrb[5].mxu0 }
  0xf7   : > { %v402_v38 = vadd.f32 %v1187_v20, %v401_v37  ;;  %v856_v39 = vpop.f32.mrb[6].mxu0  ;;  %885 = vmatprep.mubr.bf16.mxu0 %v484_v34 }
  0xf8   : > { %v413_v40 = vadd.f32 %v856_v39, %v1187_v20  ;;  %v404_v41 = vpop.f32.mrb[7].mxu0  ;;  %886 = vmatmul.mubr.bf16.vlgmr.msra.gmra.mrb[20].mxu0 %v485_v33  ;;  %v470_v43 = vmax.f32 %v410_v36, 0.0 }
  0xf9   : > { %v405_v42 = vadd.f32 %v1187_v20, %v404_v41  ;;  %v468_v45 = vmax.f32 %v402_v38, 0.0 }
  0xfa   : > { %v471_v44 = vmax.f32 %v413_v40, 0.0 }
  0xfb   : > { %v469_v46 = vmax.f32 %v405_v42, 0.0 }
  0xfc   : > { %v487_v47 = vpack.c.bf16 %v471_v44, %v470_v43 }
  0xfd   : > { %v859_v48 = vpop.f32.mrb[8].mxu0  ;;  %v486_v49 = vpack.c.bf16 %v469_v46, %v468_v45 }
  0xfe   : > { %v426_v50 = vadd.f32 %v859_v48, %v1187_v20  ;;  %v417_v51 = vpop.f32.mrb[9].mxu0 }
  0xff   : > { %v418_v52 = vadd.f32 %v1187_v20, %v417_v51  ;;  %v860_v53 = vpop.f32.mrb[10].mxu0  ;;  %889 = vmatprep.mubr.bf16.mxu1 %v486_v49 }
 0x100   : > { %v429_v54 = vadd.f32 %v860_v53, %v1187_v20  ;;  %v420_v55 = vpop.f32.mrb[11].mxu0  ;;  %890 = vmatmul.mubr.bf16.vlgmr.msra.gmra.mrb[0].mxu1 %v487_v47  ;;  %v474_v57 = vmax.f32 %v426_v50, 0.0 }
 0x101   : > { %v421_v56 = vadd.f32 %v1187_v20, %v420_v55  ;;  %v472_v59 = vmax.f32 %v418_v52, 0.0 }
 0x102   : > { %v475_v58 = vmax.f32 %v429_v54, 0.0 }
 0x103   : > { %v473_v60 = vmax.f32 %v421_v56, 0.0 }
 0x104   : > { %v489_v61 = vpack.c.bf16 %v475_v58, %v474_v57 }
 0x105   : > { %v488_v62 = vpack.c.bf16 %v473_v60, %v472_v59  ;;  %v863_v63 = vpop.f32.mrb[12].mxu0 }
 0x106   : > { %v442_v0 = vadd.f32 %v863_v63, %v1187_v20  ;;  %v433_v1 = vpop.f32.mrb[13].mxu0 }
 0x107   : > { %v434_v2 = vadd.f32 %v1187_v20, %v433_v1  ;;  %v864_v3 = vpop.f32.mrb[14].mxu0  ;;  %893 = vmatprep.mubr.bf16.mxu1 %v488_v62 }
 0x108   : > { %v445_v4 = vadd.f32 %v864_v3, %v1187_v20  ;;  %v436_v5 = vpop.f32.mrb[15].mxu0  ;;  %894 = vmatmul.mubr.bf16.gmra.mrb[4].mxu1 %v489_v61  ;;  %v478_v7 = vmax.f32 %v442_v0, 0.0 }
 0x109   : > { %v437_v6 = vadd.f32 %v1187_v20, %v436_v5  ;;  %v476_v9 = vmax.f32 %v434_v2, 0.0 }
 0x10a   : > { %v479_v8 = vmax.f32 %v445_v4, 0.0 }
 0x10b   : > { %v477_v10 = vmax.f32 %v437_v6, 0.0 }
 0x10c   : > { %v491_v11 = vpack.c.bf16 %v479_v8, %v478_v7 }
 0x10d   : > { %v490_v12 = vpack.c.bf16 %v477_v10, %v476_v9  ;;  %v867_v13 = vpop.f32.mrb[16].mxu0 }
 0x10e   : > { %v458_v14 = vadd.f32 %v867_v13, %v1187_v20  ;;  %v449_v15 = vpop.f32.mrb[17].mxu0 }
 0x10f   : > { %v450_v16 = vadd.f32 %v1187_v20, %v449_v15  ;;  %v868_v17 = vpop.f32.mrb[18].mxu0  ;;  %897 = vmatprep.mubr.bf16.mxu1 %v490_v12 }
 0x110   : > { %v461_v18 = vadd.f32 %v868_v17, %v1187_v20  ;;  %v452_v19 = vpop.f32.mrb[19].mxu0  ;;  %898 = vmatmul.mubr.bf16.gmra.mrb[8].mxu1 %v491_v11  ;;  %v482_v22 = vmax.f32 %v458_v14, 0.0 }
 0x111   : > { %v453_v21 = vadd.f32 %v1187_v20, %v452_v19  ;;  %v480_v24 = vmax.f32 %v450_v16, 0.0 }
 0x112   : > { %v483_v23 = vmax.f32 %v461_v18, 0.0 }
 0x113   : > { %v481_v25 = vmax.f32 %v453_v21, 0.0 }
 0x114   : > { %v493_v26 = vpack.c.bf16 %v483_v23, %v482_v22 }
 0x115   : > { %v492_v27 = vpack.c.bf16 %v481_v25, %v480_v24 }
 0x117   : > { %901 = vmatprep.mubr.bf16.mxu1 %v492_v27 }
 0x118   : > { %902 = vmatmul.mubr.bf16.gmra.mrb[12].mxu1 %v493_v26 }
 0x1cb   : > { %v887_v29 = vpop.f32.mrb[20].mxu0 }
 0x1cc   : > { %v608_v30 = vadd.f32 %v887_v29, %v1215_v28  ;;  %v599_v20 = vpop.f32.mrb[21].mxu0 }
 0x1cd   : > { %v600_v31 = vadd.f32 %v1215_v28, %v599_v20  ;;  %v888_v32 = vpop.f32.mrb[22].mxu0 }
 0x1ce   : > { %680 = vst [vmem:[%s1219_s26 + $0x10] sm:$0xff] %v608_v30  ;;  %v611_v33 = vadd.f32 %v888_v32, %v1215_v28  ;;  %v602_v34 = vpop.f32.mrb[23].mxu0 }
 0x1cf   : > { %678 = vst [vmem:[%s1219_s26] sm:$0xff] %v600_v31  ;;  %v603_v35 = vadd.f32 %v1215_v28, %v602_v34 }
 0x1d0   : > { %681 = vst [vmem:[%s1219_s26 + $0x18] sm:$0xff] %v611_v33 }
 0x1d1   : > { %679 = vst [vmem:[%s1219_s26 + $0x8] sm:$0xff] %v603_v35 }
 0x1d3   : > { %v891_v36 = vpop.f32.mrb[0].mxu1 }
 0x1d4   : > { %v624_v37 = vadd.f32 %v891_v36, %v1215_v28  ;;  %v615_v38 = vpop.f32.mrb[1].mxu1 }
 0x1d5   : > { %v616_v39 = vadd.f32 %v1215_v28, %v615_v38  ;;  %v892_v40 = vpop.f32.mrb[2].mxu1 }
 0x1d6   : > { %684 = vst [vmem:[%s1219_s26 + $0x30] sm:$0xff] %v624_v37  ;;  %v627_v41 = vadd.f32 %v892_v40, %v1215_v28  ;;  %v618_v42 = vpop.f32.mrb[3].mxu1 }
 0x1d7   : > { %682 = vst [vmem:[%s1219_s26 + $0x20] sm:$0xff] %v616_v39  ;;  %v619_v43 = vadd.f32 %v1215_v28, %v618_v42 }
 0x1d8   : > { %685 = vst [vmem:[%s1219_s26 + $0x38] sm:$0xff] %v627_v41 }
 0x1d9   : > { %683 = vst [vmem:[%s1219_s26 + $0x28] sm:$0xff] %v619_v43 }
 0x1db   : > { %v895_v44 = vpop.f32.mrb[4].mxu1 }
 0x1dc   : > { %v640_v45 = vadd.f32 %v895_v44, %v1215_v28  ;;  %v631_v46 = vpop.f32.mrb[5].mxu1 }
 0x1dd   : > { %v632_v47 = vadd.f32 %v1215_v28, %v631_v46  ;;  %v896_v48 = vpop.f32.mrb[6].mxu1 }
 0x1de   : > { %688 = vst [vmem:[%s1219_s26 + $0x50] sm:$0xff] %v640_v45  ;;  %v643_v49 = vadd.f32 %v896_v48, %v1215_v28  ;;  %v634_v50 = vpop.f32.mrb[7].mxu1 }
 0x1df   : > { %686 = vst [vmem:[%s1219_s26 + $0x40] sm:$0xff] %v632_v47  ;;  %v635_v51 = vadd.f32 %v1215_v28, %v634_v50 }
 0x1e0   : > { %689 = vst [vmem:[%s1219_s26 + $0x58] sm:$0xff] %v643_v49 }
 0x1e1   : > { %687 = vst [vmem:[%s1219_s26 + $0x48] sm:$0xff] %v635_v51 }
 0x1e3   : > { %v899_v52 = vpop.f32.mrb[8].mxu1 }
 0x1e4   : > { %v656_v53 = vadd.f32 %v899_v52, %v1215_v28  ;;  %v647_v54 = vpop.f32.mrb[9].mxu1 }
 0x1e5   : > { %v648_v55 = vadd.f32 %v1215_v28, %v647_v54  ;;  %v900_v56 = vpop.f32.mrb[10].mxu1 }
 0x1e6   : > { %692 = vst [vmem:[%s1219_s26 + $0x70] sm:$0xff] %v656_v53  ;;  %v659_v57 = vadd.f32 %v900_v56, %v1215_v28  ;;  %v650_v58 = vpop.f32.mrb[11].mxu1 }
 0x1e7   : > { %690 = vst [vmem:[%s1219_s26 + $0x60] sm:$0xff] %v648_v55  ;;  %v651_v59 = vadd.f32 %v1215_v28, %v650_v58 }
 0x1e8   : > { %693 = vst [vmem:[%s1219_s26 + $0x78] sm:$0xff] %v659_v57 }
 0x1e9   : > { %691 = vst [vmem:[%s1219_s26 + $0x68] sm:$0xff] %v651_v59 }
 0x1eb   : > { %v903_v60 = vpop.f32.mrb[12].mxu1 }
 0x1ec   : > { %v672_v61 = vadd.f32 %v903_v60, %v1215_v28  ;;  %v663_v62 = vpop.f32.mrb[13].mxu1 }
 0x1ed   : > { %v664_v63 = vadd.f32 %v1215_v28, %v663_v62  ;;  %v904_v0 = vpop.f32.mrb[14].mxu1 }
 0x1ee   : > { %696 = vst [vmem:[%s1219_s26 + $0x90] sm:$0xff] %v672_v61  ;;  %v675_v1 = vadd.f32 %v904_v0, %v1215_v28  ;;  %v666_v2 = vpop.f32.mrb[15].mxu1 }
 0x1ef   : > { %694 = vst [vmem:[%s1219_s26 + $0x80] sm:$0xff] %v664_v63  ;;  %v667_v3 = vadd.f32 %v1215_v28, %v666_v2 }
 0x1f0   : > { %697 = vst [vmem:[%s1219_s26 + $0x98] sm:$0xff] %v675_v1 }
 0x1f1   : > { %695 = vst [vmem:[%s1219_s26 + $0x88] sm:$0xff] %v667_v3 }
 0x1f2   : > { %996 = shalt.err (!%p993_p3)
}
 0x1f3   : > { %s997_s14 = scalar_lea.hbm %s1260_s9, 2560  ;;  %s1001_s17 = scalar_lea.hbm %s1316_s5, 5120 }
 0x1f4   : > { %p998_p4 = scmp.ne.s32.totalorder %s1260_s9, %s997_s14  ;;  %p1002_p9 = scmp.lt.u32.totalorder %s1260_s9, %s1316_s5 }
 0x1f5   : > { %p1003_p10 = scmp.lt.u32.totalorder %s1001_s17, %s997_s14  ;;  %p1005_p12 = scmp.lt.u32.totalorder %s997_s14, %s1260_s9 }
 0x1f6   : > { %p999_p7 = pnand %p998_p4, %p1118_p5 }
 0x1f7   : > { %p1004_p11 = por %p1003_p10, %p1002_p9 }
 0x1f8   : > { %p1000_p8 = pneg %p999_p7 }
 0x1f9   : > { %p1006_p13 = por %p1005_p12, %p1004_p11 }
 0x1fb   : > { %p1007_p0 = pnand %p1006_p13, %p1000_p8 }
 0x1fd   : > { %1010 = shalt.err (!%p1007_p0)
}
 0x1fe   : > { %s1048_s26 = smov 128   ;;  %s1049_s30 = smov 8  }
 0x1ff   : > { %922 = dma.vmem_to_hbm [thread:$0]  (%p1118_p5), %s1262_s6, 2560, %s1260_s9, %s1270_s22, %s1048_s26, %s1048_s26, %s1049_s30  }
 0x200 PF: > { %p928_p1 = scmp.ge.s32.totalorder %s1045_s21, 2  ;;  %s727_s7 = sand.u32 1, %s1033_s18  }
 0x201   : > { %s728_s8 = scalar_lea.sflag [#allocation3], %s727_s7 }
 0x202   : > { %p925_p2 = pnand %p928_p1, %p1122_p6 }
 0x204   : > { %1028 = dma.done.wait (!%p925_p2), %s728_s8, 2560  }
 0x205   : > { %1030 = vsyncadd (!%p925_p2), %s728_s8, 4294964736  ;;  %p15_p3 = scmp.ge.s32.totalorder %s1105_s24, 4   ;;  %s1319_s18 = smov %s1037_s19 }
 0x206   : > { %s1320_s19 = smov %s1041_s20  ;;  %s1321_s20 = smov %s1116_s27 }
 0x207   : > { %s1322_s21 = smov %s1105_s24  ;;  %17 = sbr.rel (!%p15_p3) target bundleno = 3 (0x3), region = 75 }
 0x20e   :  { %733 = vsyncpa [#allocation3], 1 }
 0x20f   :  { %735 = vsyncpa [#allocation3 + $0x1], 1 }

// kernel: tpu_custom_call.1
= control target key start
LH: loop header
LB: loop body
LE: loop exit
PB: predicated region body
PF: predicated region fallthrough
CT: control target
= control target key end

     0   :  { %10 = vsyncpa [#allocation3], 0  ;;  %s1311_s0 = inlined_call_operand.vmem [shape: bf16[320,32], index: 0, kind: input, shape index: {}]   ;;  %s1312_s1 = inlined_call_operand.vmem [shape: bf16[32,128], index: 1, kind: input, shape index: {}]   ;;  %s1313_s2 = inlined_call_operand.vmem [shape: f32[1,128], index: 2, kind: input, shape index: {}]   ;;  %s1314_s3 = inlined_call_operand.vmem [shape: bf16[128,128], index: 3, kind: input, shape index: {}]   ;;  %s1315_s4 = inlined_call_operand.vmem [shape: f32[1,128], index: 4, kind: input, shape index: {}]   ;;  %s1316_s5 = inlined_call_operand.hbm [shape: f32[320,128], index: 5, kind: output, shape index: {}]  }
   0x1   :  { %12 = vsyncpa [#allocation3 + $0x1], 0  ;;  %s1080_s18 = smov 0   ;;  %s1082_s19 = smov 0  }
   0x2   :  { %s1084_s20 = smov 0   ;;  %s1086_s21 = smov 0  }
   0x3 LB: > { %s1101_s22 = sadd.s32 4294967295, %s1045_s21   ;;  %s774_s23 = sadd.s32 4294967294, %s1045_s21   ;;  %s1045_s21 = sphi %s1086_s21, %s1322_s21   ;;  %s1041_s20 = sphi %s1084_s20, %s1321_s20   ;;  %s1037_s19 = sphi %s1082_s19, %s1320_s19   ;;  %s1033_s18 = sphi %s1080_s18, %s1319_s18  }
   0x4   : > { %s1105_s24 = sadd.s32 1, %s1045_s21   ;;  %s135_s25 = sadd.s32 1, %s1041_s20 }
   0x5   : > { %s132_s26 = ssub.s32 %s1045_s21, %s1105_s24  ;;  %p145_p0 = scmp.ne.s32.totalorder %s1041_s20, %s1037_s19 }
   0x6   : > { %p133_p1 = scmp.eq.s32.totalorder %s132_s26, 0  ;;  %p146_p2 = scmp.eq.s32.totalorder %s1101_s22, 1 }
   0x7   : > { %p151_p3 = scmp.ne.s32.totalorder %s1037_s19, %s1033_s18  ;;  %p152_p4 = scmp.eq.s32.totalorder %s774_s23, 1 }
   0x8   : > { %s1116_s27 = scalar_select %p133_p1, %s1041_s20, %s135_s25  }
   0x9   : > { %p1118_p5 = por %p146_p2, %p145_p0  ;;  %p1122_p6 = por %p152_p4, %p151_p3 }
   0xa   : > { %p777_p7 = scmp.ge.s32.totalorder %s1045_s21, 1  ;;  %p191_p8 = scmp.lt.s32.totalorder %s1045_s21, 3 }
   0xc   : > { %p192_p9 = pnand %p777_p7, %p191_p8 }
   0xd   : > { %v963_v0 = vld [vmem:[%s1312_s1] sm:$0xff] (!%p192_p9)   ;;  %s219_s7 = smul.u32 (!%p192_p9), 20, %s1101_s22  ;;  %v964_v1 = vld [vmem:[%s1312_s1 + $0x8] sm:$0xff] (!%p192_p9)   ;;  %vm320_vm0 = vcmask (!%p192_p9), 261120   ;;  %v977_v4 = vld [vmem:[%s1314_s3 + $0x10] sm:$0xff] (!%p192_p9)   ;;  %s216_s16 = sand.u32 (!%p192_p9), 1, %s1037_s19  }
   0xe   : > { %195 = sbr.rel (%p192_p9) target bundleno = 512 (0x200), region = 40  ;;  %845 = vmatprep.subr.bf16.mxu0 (!%p192_p9), %v963_v0  ;;  %v975_v2 = vld [vmem:[%s1314_s3] sm:$0xff] (!%p192_p9)   ;;  %v976_v3 = vld [vmem:[%s1314_s3 + $0x8] sm:$0xff] (!%p192_p9)   ;;  %v978_v8 = vld [vmem:[%s1314_s3 + $0x18] sm:$0xff] (!%p192_p9)   ;;  %s1047_s11 = smov (!%p192_p9), [#allocation2]  }
   0xf   : > { %p220_p10 = scmp.lt.s32.totalorder (!%p192_p9), %s219_s7, 39  ;;  %846 = vmatpush3.bf16.msra.mxu0 (!%p192_p9), %v963_v0  ;;  %905 = vmatprep.subr.bf16.mxu1 (!%p192_p9), %v975_v2  ;;  %v979_v9 = vld [vmem:[%s1314_s3 + $0x20] sm:$0xff] (!%p192_p9)   ;;  %v980_v12 = vld [vmem:[%s1314_s3 + $0x28] sm:$0xff] (!%p192_p9)   ;;  %v981_v18 = vld [vmem:[%s1314_s3 + $0x30] sm:$0xff] (!%p192_p9)   ;;  %s814_s30 = smul.u32 (!%p192_p9), 2560, %s1101_s22 }
  0x10   : > { %847 = vmatprep.subr.bf16.mxu0 (!%p192_p9), %v964_v1  ;;  %913 = vmatpush3.bf16.msra.mxu1 (!%p192_p9), %v975_v2  ;;  %v982_v19 = vld [vmem:[%s1314_s3 + $0x38] sm:$0xff] (!%p192_p9)   ;;  %v1187_v20 = vld [vmem:[%s1313_s2] ss:$0 sm:$0xff] (!%p192_p9)  ;;  %s1270_s22 = scalar_lea.sflag (!%p192_p9), [#allocation3], %s216_s16  ;;  %s987_s12 = sshll.u32 (!%p192_p9), %s1047_s11, 4  ;;  %s988_s12 = int_to_ptr.vmem [resolvable:$false] %s987_s12 }
  0x11   : > { %906 = vmatprep.subr.bf16.mxu1 (!%p192_p9), %v976_v3  ;;  %s1260_s9 = scalar_lea.hbm (!%p192_p9), %s1316_s5, %s814_s30  ;;  %s989_s13 = scalar_lea.vmem (!%p192_p9), %s988_s12, 5120 }
  0x13   : > { %848 = vmatpush3.bf16.msra.mxu0 (!%p192_p9), %v964_v1 }
  0x14   : > { %869 = vmatprep.subr.bf16.mxu0 (!%p192_p9), %v975_v2  ;;  %914 = vmatpush3.bf16.msra.mxu1 (!%p192_p9), %v976_v3 }
  0x15   : > { %s1324_s7 = smov (!%p220_p10, %s219_s7), 39  ;;  %907 = vmatprep.subr.bf16.mxu1 %v977_v4 }
  0x16   : > { %s778_s14 = sshll.u32 %s1324_s7, 2 }
  0x17   : > { %s1144_s17 = scalar_lea.vmem %s1311_s0, %s778_s14 }
  0x18   : > { %v965_v5 = vld [vmem:[%s1144_s17] sm:$0xff]   ;;  %v966_v6 = vld [vmem:[%s1144_s17 + $0x8] sm:$0xff]   ;;  %v967_v7 = vld [vmem:[%s1144_s17 + $0x10] sm:$0xff]   ;;  %915 = vmatpush3.bf16.msra.mxu1 %v977_v4 }
  0x19   : > { %849 = vmatprep.mubr.msk.bf16.mxu0 %vm320_vm0, %v965_v5  ;;  %908 = vmatprep.subr.bf16.mxu1 %v978_v8  ;;  %v968_v10 = vld [vmem:[%s1144_s17 + $0x18] sm:$0xff]   ;;  %v969_v11 = vld [vmem:[%s1144_s17 + $0x20] sm:$0xff]   ;;  %v970_v13 = vld [vmem:[%s1144_s17 + $0x28] sm:$0xff]  }
  0x1a   : > { %850 = vmatmul.mubr.msk.bf16.vlgmr.msra.gmra.mrb[0].mxu0 %vm320_vm0, %v966_v6  ;;  %v971_v14 = vld [vmem:[%s1144_s17 + $0x30] sm:$0xff]   ;;  %v972_v15 = vld [vmem:[%s1144_s17 + $0x38] sm:$0xff]   ;;  %v973_v16 = vld [vmem:[%s1144_s17 + $0x40] sm:$0xff]  }
  0x1b   : > { %853 = vmatprep.mubr.msk.bf16.mxu0 %vm320_vm0, %v967_v7  ;;  %870 = vmatpush3.bf16.msra.mxu0 %v975_v2  ;;  %v974_v17 = vld [vmem:[%s1144_s17 + $0x48] sm:$0xff]   ;;  %s921_s17 = smul.u32 160, %s216_s16 }
  0x1c   : > { %871 = vmatprep.subr.bf16.mxu0 %v976_v3  ;;  %916 = vmatpush3.bf16.msra.mxu1 %v978_v8 }
  0x1d   : > { %909 = vmatprep.subr.bf16.mxu1 %v979_v9  ;;  %s1219_s26 = scalar_lea.vmem [#allocation2], %s921_s17 }
  0x1e   : > { %s712_s6 = sshll.u32 %s1219_s26, 4  ;;  %s1262_s6 = int_to_ptr.vmem [resolvable:$true] %s712_s6 }
  0x1f   : > { %872 = vmatpush3.bf16.msra.mxu0 %v976_v3  ;;  %s983_s10 = scalar_lea.vmem %s1262_s6, 2560  ;;  %p990_p0 = scmp.lt.s32.totalorder %s1262_s6, %s988_s12 }
  0x20   : > { %873 = vmatprep.subr.bf16.mxu0 %v977_v4  ;;  %917 = vmatpush3.bf16.msra.mxu1 %v979_v9  ;;  %p984_p11 = scmp.ne.s32.totalorder %s1262_s6, %s983_s10  ;;  %p991_p1 = scmp.lt.s32.totalorder %s989_s13, %s983_s10 }
  0x21   : > { %910 = vmatprep.subr.bf16.mxu1 %v980_v12 }
  0x22   : > { %854 = vmatmul.mubr.msk.bf16.gmra.mrb[4].mxu0 %vm320_vm0, %v968_v10  ;;  %p985_p12 = pnand %p984_p11, %p1118_p5  ;;  %p992_p2 = por %p991_p1, %p990_p0 }
  0x23   : > { %857 = vmatprep.mubr.msk.bf16.mxu0 %vm320_vm0, %v969_v11  ;;  %874 = vmatpush3.bf16.msra.mxu0 %v977_v4 }
  0x24   : > { %875 = vmatprep.subr.bf16.mxu0 %v978_v8  ;;  %918 = vmatpush3.bf16.msra.mxu1 %v980_v12  ;;  %p986_p13 = pneg %p985_p12 }
  0x25   : > { %911 = vmatprep.subr.bf16.mxu1 %v981_v18 }
  0x26   : > { %p993_p3 = pnand %p992_p2, %p986_p13 }
  0x27   : > { %876 = vmatpush3.bf16.msra.mxu0 %v978_v8 }
  0x28   : > { %877 = vmatprep.subr.bf16.mxu0 %v979_v9  ;;  %919 = vmatpush3.bf16.msra.mxu1 %v981_v18 }
  0x29   : > { %912 = vmatprep.subr.bf16.mxu1 %v982_v19 }
  0x2a   : > { %858 = vmatmul.mubr.msk.bf16.gmra.mrb[8].mxu0 %vm320_vm0, %v970_v13 }
  0x2b   : > { %861 = vmatprep.mubr.msk.bf16.mxu0 %vm320_vm0, %v971_v14  ;;  %878 = vmatpush3.bf16.msra.mxu0 %v979_v9 }
  0x2c   : > { %879 = vmatprep.subr.bf16.mxu0 %v980_v12  ;;  %920 = vmatpush3.bf16.msra.mxu1 %v982_v19 }
  0x2f   : > { %880 = vmatpush3.bf16.msra.mxu0 %v980_v12 }
  0x30   : > { %881 = vmatprep.subr.bf16.mxu0 %v981_v18 }
  0x32   : > { %862 = vmatmul.mubr.msk.bf16.gmra.mrb[12].mxu0 %vm320_vm0, %v972_v15 }
  0x33   : > { %865 = vmatprep.mubr.msk.bf16.mxu0 %vm320_vm0, %v973_v16  ;;  %882 = vmatpush3.bf16.msra.mxu0 %v981_v18 }
  0x34   : > { %883 = vmatprep.subr.bf16.mxu0 %v982_v19 }
  0x37   : > { %884 = vmatpush3.bf16.msra.mxu0 %v982_v19 }
  0x3a   : > { %866 = vmatmul.mubr.msk.bf16.gmra.mrb[16].mxu0 %vm320_vm0, %v974_v17 }
  0xed   : > { %v851_v21 = vpop.f32.mrb[0].mxu0 }
  0xee   : > { %v394_v22 = vadd.f32 %v851_v21, %v1187_v20  ;;  %v385_v23 = vpop.f32.mrb[1].mxu0 }
  0xef   : > { %v386_v24 = vadd.f32 %v1187_v20, %v385_v23  ;;  %v852_v25 = vpop.f32.mrb[2].mxu0 }
  0xf0   : > { %v397_v26 = vadd.f32 %v852_v25, %v1187_v20  ;;  %v388_v27 = vpop.f32.mrb[3].mxu0  ;;  %v466_v29 = vmax.f32 %v394_v22, 0.0 }
  0xf1   : > { %v389_v28 = vadd.f32 %v1187_v20, %v388_v27  ;;  %v464_v31 = vmax.f32 %v386_v24, 0.0 }
  0xf2   : > { %v467_v30 = vmax.f32 %v397_v26, 0.0 }
  0xf3   : > { %v465_v32 = vmax.f32 %v389_v28, 0.0  ;;  %v1215_v28 = vld [vmem:[%s1315_s4] ss:$0 sm:$0xff] }
  0xf4   : > { %v485_v33 = vpack.c.bf16 %v467_v30, %v466_v29 }
  0xf5   : > { %v484_v34 = vpack.c.bf16 %v465_v32, %v464_v31  ;;  %v855_v35 = vpop.f32.mrb[4].mxu0 }
  0xf6   : > { %v410_v36 = vadd.f32 %v855_v35, %v1187_v20  ;;  %v401_v37 = vpop.f32.mrb[5].mxu0 }
  0xf7   : > { %v402_v38 = vadd.f32 %v1187_v20, %v401_v37  ;;  %v856_v39 = vpop.f32.mrb[6].mxu0  ;;  %885 = vmatprep.mubr.bf16.mxu0 %v484_v34 }
  0xf8   : > { %v413_v40 = vadd.f32 %v856_v39, %v1187_v20  ;;  %v404_v41 = vpop.f32.mrb[7].mxu0  ;;  %886 = vmatmul.mubr.bf16.vlgmr.msra.gmra.mrb[20].mxu0 %v485_v33  ;;  %v470_v43 = vmax.f32 %v410_v36, 0.0 }
  0xf9   : > { %v405_v42 = vadd.f32 %v1187_v20, %v404_v41  ;;  %v468_v45 = vmax.f32 %v402_v38, 0.0 }
  0xfa   : > { %v471_v44 = vmax.f32 %v413_v40, 0.0 }
  0xfb   : > { %v469_v46 = vmax.f32 %v405_v42, 0.0 }
  0xfc   : > { %v487_v47 = vpack.c.bf16 %v471_v44, %v470_v43 }
  0xfd   : > { %v859_v48 = vpop.f32.mrb[8].mxu0  ;;  %v486_v49 = vpack.c.bf16 %v469_v46, %v468_v45 }
  0xfe   : > { %v426_v50 = vadd.f32 %v859_v48, %v1187_v20  ;;  %v417_v51 = vpop.f32.mrb[9].mxu0 }
  0xff   : > { %v418_v52 = vadd.f32 %v1187_v20, %v417_v51  ;;  %v860_v53 = vpop.f32.mrb[10].mxu0  ;;  %889 = vmatprep.mubr.bf16.mxu1 %v486_v49 }
 0x100   : > { %v429_v54 = vadd.f32 %v860_v53, %v1187_v20  ;;  %v420_v55 = vpop.f32.mrb[11].mxu0  ;;  %890 = vmatmul.mubr.bf16.vlgmr.msra.gmra.mrb[0].mxu1 %v487_v47  ;;  %v474_v57 = vmax.f32 %v426_v50, 0.0 }
 0x101   : > { %v421_v56 = vadd.f32 %v1187_v20, %v420_v55  ;;  %v472_v59 = vmax.f32 %v418_v52, 0.0 }
 0x102   : > { %v475_v58 = vmax.f32 %v429_v54, 0.0 }
 0x103   : > { %v473_v60 = vmax.f32 %v421_v56, 0.0 }
 0x104   : > { %v489_v61 = vpack.c.bf16 %v475_v58, %v474_v57 }
 0x105   : > { %v488_v62 = vpack.c.bf16 %v473_v60, %v472_v59  ;;  %v863_v63 = vpop.f32.mrb[12].mxu0 }
 0x106   : > { %v442_v0 = vadd.f32 %v863_v63, %v1187_v20  ;;  %v433_v1 = vpop.f32.mrb[13].mxu0 }
 0x107   : > { %v434_v2 = vadd.f32 %v1187_v20, %v433_v1  ;;  %v864_v3 = vpop.f32.mrb[14].mxu0  ;;  %893 = vmatprep.mubr.bf16.mxu1 %v488_v62 }
 0x108   : > { %v445_v4 = vadd.f32 %v864_v3, %v1187_v20  ;;  %v436_v5 = vpop.f32.mrb[15].mxu0  ;;  %894 = vmatmul.mubr.bf16.gmra.mrb[4].mxu1 %v489_v61  ;;  %v478_v7 = vmax.f32 %v442_v0, 0.0 }
 0x109   : > { %v437_v6 = vadd.f32 %v1187_v20, %v436_v5  ;;  %v476_v9 = vmax.f32 %v434_v2, 0.0 }
 0x10a   : > { %v479_v8 = vmax.f32 %v445_v4, 0.0 }
 0x10b   : > { %v477_v10 = vmax.f32 %v437_v6, 0.0 }
 0x10c   : > { %v491_v11 = vpack.c.bf16 %v479_v8, %v478_v7 }
 0x10d   : > { %v490_v12 = vpack.c.bf16 %v477_v10, %v476_v9  ;;  %v867_v13 = vpop.f32.mrb[16].mxu0 }
 0x10e   : > { %v458_v14 = vadd.f32 %v867_v13, %v1187_v20  ;;  %v449_v15 = vpop.f32.mrb[17].mxu0 }
 0x10f   : > { %v450_v16 = vadd.f32 %v1187_v20, %v449_v15  ;;  %v868_v17 = vpop.f32.mrb[18].mxu0  ;;  %897 = vmatprep.mubr.bf16.mxu1 %v490_v12 }
 0x110   : > { %v461_v18 = vadd.f32 %v868_v17, %v1187_v20  ;;  %v452_v19 = vpop.f32.mrb[19].mxu0  ;;  %898 = vmatmul.mubr.bf16.gmra.mrb[8].mxu1 %v491_v11  ;;  %v482_v22 = vmax.f32 %v458_v14, 0.0 }
 0x111   : > { %v453_v21 = vadd.f32 %v1187_v20, %v452_v19  ;;  %v480_v24 = vmax.f32 %v450_v16, 0.0 }
 0x112   : > { %v483_v23 = vmax.f32 %v461_v18, 0.0 }
 0x113   : > { %v481_v25 = vmax.f32 %v453_v21, 0.0 }
 0x114   : > { %v493_v26 = vpack.c.bf16 %v483_v23, %v482_v22 }
 0x115   : > { %v492_v27 = vpack.c.bf16 %v481_v25, %v480_v24 }
 0x117   : > { %901 = vmatprep.mubr.bf16.mxu1 %v492_v27 }
 0x118   : > { %902 = vmatmul.mubr.bf16.gmra.mrb[12].mxu1 %v493_v26 }
 0x1cb   : > { %v887_v29 = vpop.f32.mrb[20].mxu0 }
 0x1cc   : > { %v608_v30 = vadd.f32 %v887_v29, %v1215_v28  ;;  %v599_v20 = vpop.f32.mrb[21].mxu0 }
 0x1cd   : > { %v600_v31 = vadd.f32 %v1215_v28, %v599_v20  ;;  %v888_v32 = vpop.f32.mrb[22].mxu0 }
 0x1ce   : > { %680 = vst [vmem:[%s1219_s26 + $0x10] sm:$0xff] %v608_v30  ;;  %v611_v33 = vadd.f32 %v888_v32, %v1215_v28  ;;  %v602_v34 = vpop.f32.mrb[23].mxu0 }
 0x1cf   : > { %678 = vst [vmem:[%s1219_s26] sm:$0xff] %v600_v31  ;;  %v603_v35 = vadd.f32 %v1215_v28, %v602_v34 }
 0x1d0   : > { %681 = vst [vmem:[%s1219_s26 + $0x18] sm:$0xff] %v611_v33 }
 0x1d1   : > { %679 = vst [vmem:[%s1219_s26 + $0x8] sm:$0xff] %v603_v35 }
 0x1d3   : > { %v891_v36 = vpop.f32.mrb[0].mxu1 }
 0x1d4   : > { %v624_v37 = vadd.f32 %v891_v36, %v1215_v28  ;;  %v615_v38 = vpop.f32.mrb[1].mxu1 }
 0x1d5   : > { %v616_v39 = vadd.f32 %v1215_v28, %v615_v38  ;;  %v892_v40 = vpop.f32.mrb[2].mxu1 }
 0x1d6   : > { %684 = vst [vmem:[%s1219_s26 + $0x30] sm:$0xff] %v624_v37  ;;  %v627_v41 = vadd.f32 %v892_v40, %v1215_v28  ;;  %v618_v42 = vpop.f32.mrb[3].mxu1 }
 0x1d7   : > { %682 = vst [vmem:[%s1219_s26 + $0x20] sm:$0xff] %v616_v39  ;;  %v619_v43 = vadd.f32 %v1215_v28, %v618_v42 }
 0x1d8   : > { %685 = vst [vmem:[%s1219_s26 + $0x38] sm:$0xff] %v627_v41 }
 0x1d9   : > { %683 = vst [vmem:[%s1219_s26 + $0x28] sm:$0xff] %v619_v43 }
 0x1db   : > { %v895_v44 = vpop.f32.mrb[4].mxu1 }
 0x1dc   : > { %v640_v45 = vadd.f32 %v895_v44, %v1215_v28  ;;  %v631_v46 = vpop.f32.mrb[5].mxu1 }
 0x1dd   : > { %v632_v47 = vadd.f32 %v1215_v28, %v631_v46  ;;  %v896_v48 = vpop.f32.mrb[6].mxu1 }
 0x1de   : > { %688 = vst [vmem:[%s1219_s26 + $0x50] sm:$0xff] %v640_v45  ;;  %v643_v49 = vadd.f32 %v896_v48, %v1215_v28  ;;  %v634_v50 = vpop.f32.mrb[7].mxu1 }
 0x1df   : > { %686 = vst [vmem:[%s1219_s26 + $0x40] sm:$0xff] %v632_v47  ;;  %v635_v51 = vadd.f32 %v1215_v28, %v634_v50 }
 0x1e0   : > { %689 = vst [vmem:[%s1219_s26 + $0x58] sm:$0xff] %v643_v49 }
 0x1e1   : > { %687 = vst [vmem:[%s1219_s26 + $0x48] sm:$0xff] %v635_v51 }
 0x1e3   : > { %v899_v52 = vpop.f32.mrb[8].mxu1 }
 0x1e4   : > { %v656_v53 = vadd.f32 %v899_v52, %v1215_v28  ;;  %v647_v54 = vpop.f32.mrb[9].mxu1 }
 0x1e5   : > { %v648_v55 = vadd.f32 %v1215_v28, %v647_v54  ;;  %v900_v56 = vpop.f32.mrb[10].mxu1 }
 0x1e6   : > { %692 = vst [vmem:[%s1219_s26 + $0x70] sm:$0xff] %v656_v53  ;;  %v659_v57 = vadd.f32 %v900_v56, %v1215_v28  ;;  %v650_v58 = vpop.f32.mrb[11].mxu1 }
 0x1e7   : > { %690 = vst [vmem:[%s1219_s26 + $0x60] sm:$0xff] %v648_v55  ;;  %v651_v59 = vadd.f32 %v1215_v28, %v650_v58 }
 0x1e8   : > { %693 = vst [vmem:[%s1219_s26 + $0x78] sm:$0xff] %v659_v57 }
 0x1e9   : > { %691 = vst [vmem:[%s1219_s26 + $0x68] sm:$0xff] %v651_v59 }
 0x1eb   : > { %v903_v60 = vpop.f32.mrb[12].mxu1 }
 0x1ec   : > { %v672_v61 = vadd.f32 %v903_v60, %v1215_v28  ;;  %v663_v62 = vpop.f32.mrb[13].mxu1 }
 0x1ed   : > { %v664_v63 = vadd.f32 %v1215_v28, %v663_v62  ;;  %v904_v0 = vpop.f32.mrb[14].mxu1 }
 0x1ee   : > { %696 = vst [vmem:[%s1219_s26 + $0x90] sm:$0xff] %v672_v61  ;;  %v675_v1 = vadd.f32 %v904_v0, %v1215_v28  ;;  %v666_v2 = vpop.f32.mrb[15].mxu1 }
 0x1ef   : > { %694 = vst [vmem:[%s1219_s26 + $0x80] sm:$0xff] %v664_v63  ;;  %v667_v3 = vadd.f32 %v1215_v28, %v666_v2 }
 0x1f0   : > { %697 = vst [vmem:[%s1219_s26 + $0x98] sm:$0xff] %v675_v1 }
 0x1f1   : > { %695 = vst [vmem:[%s1219_s26 + $0x88] sm:$0xff] %v667_v3 }
 0x1f2   : > { %996 = shalt.err (!%p993_p3)
}
 0x1f3   : > { %s997_s14 = scalar_lea.hbm %s1260_s9, 2560  ;;  %s1001_s17 = scalar_lea.hbm %s1316_s5, 5120 }
 0x1f4   : > { %p998_p4 = scmp.ne.s32.totalorder %s1260_s9, %s997_s14  ;;  %p1002_p9 = scmp.lt.u32.totalorder %s1260_s9, %s1316_s5 }
 0x1f5   : > { %p1003_p10 = scmp.lt.u32.totalorder %s1001_s17, %s997_s14  ;;  %p1005_p12 = scmp.lt.u32.totalorder %s997_s14, %s1260_s9 }
 0x1f6   : > { %p999_p7 = pnand %p998_p4, %p1118_p5 }
 0x1f7   : > { %p1004_p11 = por %p1003_p10, %p1002_p9 }
 0x1f8   : > { %p1000_p8 = pneg %p999_p7 }
 0x1f9   : > { %p1006_p13 = por %p1005_p12, %p1004_p11 }
 0x1fb   : > { %p1007_p0 = pnand %p1006_p13, %p1000_p8 }
 0x1fd   : > { %1010 = shalt.err (!%p1007_p0)
}
 0x1fe   : > { %s1048_s26 = smov 128   ;;  %s1049_s30 = smov 8  }
 0x1ff   : > { %922 = dma.vmem_to_hbm [thread:$0]  (%p1118_p5), %s1262_s6, 2560, %s1260_s9, %s1270_s22, %s1048_s26, %s1048_s26, %s1049_s30  }
 0x200 PF: > { %p928_p1 = scmp.ge.s32.totalorder %s1045_s21, 2  ;;  %s727_s7 = sand.u32 1, %s1033_s18  }
 0x201   : > { %s728_s8 = scalar_lea.sflag [#allocation3], %s727_s7 }
 0x202   : > { %p925_p2 = pnand %p928_p1, %p1122_p6 }
 0x204   : > { %1028 = dma.done.wait (!%p925_p2), %s728_s8, 2560  }
 0x205   : > { %1030 = vsyncadd (!%p925_p2), %s728_s8, 4294964736  ;;  %p15_p3 = scmp.ge.s32.totalorder %s1105_s24, 4   ;;  %s1319_s18 = smov %s1037_s19 }
 0x206   : > { %s1320_s19 = smov %s1041_s20  ;;  %s1321_s20 = smov %s1116_s27 }
 0x207   : > { %s1322_s21 = smov %s1105_s24  ;;  %17 = sbr.rel (!%p15_p3) target bundleno = 3 (0x3), region = 75 }
 0x20e   :  { %733 = vsyncpa [#allocation3], 1 }
 0x20f   :  { %735 = vsyncpa [#allocation3 + $0x1], 1 }

</bundles_post_ra>
